<compile_context>
chip_gen: v6e
topology: v6e:2x2x1
jax: 0.10.0
libtpu: 0.0.40
codegen_flags: <defaults>
</compile_context>

<pallas_src>
import jax
import jax.numpy as jnp
from jax.experimental import pallas as pl
from jax.experimental.pallas import tpu as pltpu


# ----------------------------------------------------------------------------
# In-kernel exact-GELU helper (erf form, matches PyTorch nn.GELU default)
# ----------------------------------------------------------------------------
def _erf_poly(z):
    # Abramowitz & Stegun 7.1.26 polynomial erf, |err| < 1.5e-7.
    a1, a2, a3, a4, a5 = 0.254829592, -0.284496736, 1.421413741, -1.453152027, 1.061405429
    p = 0.3275911
    s = jnp.where(z >= 0.0, 1.0, -1.0)
    az = jnp.abs(z)
    # EUP-slot approximate reciprocal: co-issues with the VALU polynomial.
    t = pl.reciprocal(1.0 + p * az, approx=True)
    poly = t * (a1 + t * (a2 + t * (a3 + t * (a4 + t * a5))))
    return s * (1.0 - poly * jnp.exp(-(az * az)))


def _gelu_exact(x):
    return 0.5 * x * (1.0 + _erf_poly(x * 0.7071067811865476))


# ----------------------------------------------------------------------------
# Fused Mlp kernel: hidden-chunked  (W1c @ X + b1c) -> GELU -> acc += W2c @ .
# ----------------------------------------------------------------------------
def _mlp_kernel(x_ref, w1_ref, b1_ref, w2_ref, b2_ref, o_ref, acc_ref):
    # x:   (1, Cin, tm)   native dtype (cast in-kernel)
    # w1:  (chunk, Cin)   bf16          b1: (chunk, 1) f32
    # w2:  (Cout, chunk)  bf16          b2: (Cout, 1)  f32
    # o:   (1, Cout, tm)  out_dtype
    # acc: (Cout, tm)     f32 scratch, resident across the hidden-chunk axis
    c = pl.program_id(2)

    @pl.when(c == 0)
    def _init():
        acc_ref[...] = jnp.zeros_like(acc_ref)

    x = x_ref[0].astype(w1_ref.dtype)                                   # (Cin, tm)
    h = jnp.dot(w1_ref[...], x, preferred_element_type=jnp.float32)     # (chunk, tm)
    h = h + b1_ref[...]                                                 # f32 epilogue
    h = _gelu_exact(h)
    # TODO(synk): nn.Dropout(drop) is modeled as identity (eval / drop=0.0);
    # a train-mode kernel would mask with pltpu.prng_seed / prng_random_bits.
    acc_ref[...] += jnp.dot(w2_ref[...], h.astype(w2_ref.dtype),
                            preferred_element_type=jnp.float32)         # (Cout, tm)

    @pl.when(c == pl.num_programs(2) - 1)
    def _finalize():
        o_ref[0] = (acc_ref[...] + b2_ref[...]).astype(o_ref.dtype)


# ----------------------------------------------------------------------------
# VMEM-budget-aware tile / chunk planner
# ----------------------------------------------------------------------------
def _round_up(a, b):
    return (a + b - 1) // b * b


def _vmem_estimate(cin, chunk, cout, tm, x_bytes, out_bytes):
    wb = 2                                                      # bf16 weights
    weights = 2 * (chunk * cin + cout * chunk) * wb             # dbl-buffered chunks
    biases = 2 * (chunk + cout) * 128 * 4                       # (.,1) f32, lane-padded
    acts = 2 * cin * tm * x_bytes + 2 * cout * tm * out_bytes   # dbl-buffered x / out
    scratch = cout * tm * 4                                     # f32 accumulator
    temps = cin * tm * wb + chunk * tm * (3 * 4 + wb) + cout * tm * 4
    return weights + biases + acts + scratch + temps


def _plan_tiles(n, cin, ch, cout, hw, x_bytes, out_bytes, budget, hidden_chunk=None):
    # Hidden-chunk candidates: must divide Ch; multiple of 128 or == Ch.
    if hidden_chunk is not None:
        chunks = [hidden_chunk]
    else:
        chunks = [d for d in (1024, 512, 256, 128) if ch % d == 0]
        if ch <= 1024 or not chunks:
            chunks = [ch] + chunks
    # Pixel-tile candidates: lane-dense (multiple of 128, prefer 256 for MXU).
    if hw < 128:
        tms = [hw]                                   # full dim (allowed)
    else:
        hw128 = _round_up(hw, 128)
        tms = [t for t in (2048, 1536, 1024, 768, 512, 256, 128) if t <= hw128] or [128]

    def finish(tm, ck):
        # Guarantee >= 2 parallel grid steps (v7x has 2 TensorCores).
        while (n * pl.cdiv(hw, tm) < 2 and tm > 128 and (tm // 2) % 128 == 0):
            tm //= 2
        return tm, ck

    for tm in tms:
        for ck in chunks:
            if _vmem_estimate(cin, ck, cout, tm, x_bytes, out_bytes) <= budget:
                return finish(tm, ck)
    return finish(tms[-1], chunks[-1])


# ----------------------------------------------------------------------------
# Wrapper
# ----------------------------------------------------------------------------
def mlp_forward(x_nchw, params, *, compute_dtype=jnp.bfloat16, out_dtype=None,
                hidden_chunk=None, vmem_budget_bytes=40 * 1024 * 1024):
    """Mlp.forward (1x1 conv -> GELU -> 1x1 conv) for NCHW input, inference."""
    w1, b1 = params["fc1_w"], params["fc1_b"]
    w2, b2 = params["fc2_w"], params["fc2_b"]
    N, Cin, H, W = x_nchw.shape
    Ch = w1.shape[0]
    Cout = w2.shape[0]
    HW = H * W
    out_dtype = out_dtype if out_dtype is not None else x_nchw.dtype

    # Free reshape only: no transpose, no pad, no dtype pre-pass.
    x3 = x_nchw.reshape(N, Cin, HW)

    # PyTorch Conv2d weight (Cout, Cin, 1, 1) -> (Cout, Cin); weights are tiny
    # relative to activations, so casting them once here is cheap.
    w1m = w1.reshape(Ch, Cin).astype(compute_dtype)
    w2m = w2.reshape(Cout, Ch).astype(compute_dtype)
    b1m = b1.reshape(Ch, 1).astype(jnp.float32)
    b2m = b2.reshape(Cout, 1).astype(jnp.float32)

    tm, chunk = _plan_tiles(N, Cin, Ch, Cout, HW,
                            x_bytes=x3.dtype.itemsize,
                            out_bytes=jnp.dtype(out_dtype).itemsize,
                            budget=vmem_budget_bytes,
                            hidden_chunk=hidden_chunk)
    assert Ch % chunk == 0, (Ch, chunk)
    grid = (N, pl.cdiv(HW, tm), Ch // chunk)

    vmem_est = _vmem_estimate(Cin, chunk, Cout, tm,
                              x3.dtype.itemsize, jnp.dtype(out_dtype).itemsize)
    vmem_limit = int(min(max(vmem_est * 1.25, 32 * 1024 * 1024), 56 * 1024 * 1024))

    out = pl.pallas_call(
        _mlp_kernel,
        out_shape=jax.ShapeDtypeStruct((N, Cout, HW), out_dtype),
        grid=grid,
        in_specs=[
            pl.BlockSpec((1, Cin, tm), lambda n, i, c: (n, 0, i)),
            pl.BlockSpec((chunk, Cin), lambda n, i, c: (c, 0)),
            pl.BlockSpec((chunk, 1), lambda n, i, c: (c, 0)),
            pl.BlockSpec((Cout, chunk), lambda n, i, c: (0, c)),
            pl.BlockSpec((Cout, 1), lambda n, i, c: (0, 0)),
        ],
        out_specs=pl.BlockSpec((1, Cout, tm), lambda n, i, c: (n, 0, i)),
        scratch_shapes=[pltpu.VMEM((Cout, tm), jnp.float32)],
        compiler_params=pltpu.CompilerParams(
            dimension_semantics=("parallel", "parallel", "arbitrary"),
            vmem_limit_bytes=vmem_limit),
    )(x3, w1m, b1m, w2m, b2m)

    return out.reshape(N, Cout, H, W)


# ----------------------------------------------------------------------------
# Pure-JAX reference (for in-script validation)
# ----------------------------------------------------------------------------
def mlp_reference(x_nchw, params):
    N, Cin, H, W = x_nchw.shape
    w1 = params["fc1_w"].reshape(params["fc1_w"].shape[0], Cin)
    w2 = params["fc2_w"].reshape(params["fc2_w"].shape[0], w1.shape[0])
    b1, b2 = params["fc1_b"], params["fc2_b"]
    xf = x_nchw.reshape(N, Cin, H * W).astype(jnp.float32)
    h = jnp.einsum("oc,ncm->nom", w1, xf) + b1[None, :, None]
    h = jax.nn.gelu(h, approximate=False)          # PyTorch nn.GELU default (erf)
    y = jnp.einsum("oc,ncm->nom", w2, h) + b2[None, :, None]
    return y.reshape(N, w2.shape[0], H, W)


# ----------------------------------------------------------------------------
# Deterministic parameter construction (PyTorch Conv2d default init)
# ----------------------------------------------------------------------------
def _conv1x1_params(key, cout, cin):
    kw, kb = jax.random.split(key)
    bound = 1.0 / (cin ** 0.5)
    w = jax.random.uniform(kw, (cout, cin, 1, 1), jnp.float32, -bound, bound)
    b = jax.random.uniform(kb, (cout,), jnp.float32, -bound, bound)
    return w, b


def init_mlp_params(key, in_features, hidden_features=None, out_features=None):
    hidden_features = hidden_features or in_features
    out_features = out_features or in_features
    k1, k2 = jax.random.split(key)
    p = {}
    p["fc1_w"], p["fc1_b"] = _conv1x1_params(k1, hidden_features, in_features)
    p["fc2_w"], p["fc2_b"] = _conv1x1_params(k2, out_features, in_features and hidden_features)
    return p


if __name__ == "__main__":
    key = jax.random.PRNGKey(0)

    # ---- Test 1: small square shapes, single hidden chunk, f32 output -------
    kx, kp, key = jax.random.split(key, 3)
    N, C, H, W = 2, 16, 16, 16
    HIDDEN = 32
    x = jax.random.normal(kx, (N, C, H, W), jnp.float32)
    params = init_mlp_params(kp, in_features=C, hidden_features=HIDDEN)

    out = jax.block_until_ready(mlp_forward(x, params))
    ref = jax.block_until_ready(mlp_reference(x, params))
    assert out.shape == (N, C, H, W), out.shape
    assert bool(jnp.all(jnp.isfinite(out)))
    err1 = float(jnp.max(jnp.abs(out.astype(jnp.float32) - ref)))
    assert err1 < 5e-2, f"test1 max abs err vs reference: {err1}"

    # ---- Test 2: hidden-axis chunking + masked edge block (HW=400 not a
    #      multiple of 128) + single-batch megacore split + bf16 output -------
    kx2, kp2, key = jax.random.split(key, 3)
    N2, C2, H2, W2 = 1, 64, 20, 20
    HIDDEN2 = 512
    x2 = jax.random.normal(kx2, (N2, C2, H2, W2), jnp.float32)
    params2 = init_mlp_params(kp2, in_features=C2, hidden_features=HIDDEN2)

    out2 = jax.block_until_ready(
        mlp_forward(x2, params2, out_dtype=jnp.bfloat16, hidden_chunk=256))
    ref2 = jax.block_until_ready(mlp_reference(x2, params2))
    assert out2.shape == (N2, C2, H2, W2), out2.shape
    assert out2.dtype == jnp.bfloat16
    assert bool(jnp.all(jnp.isfinite(out2.astype(jnp.float32))))
    err2 = float(jnp.max(jnp.abs(out2.astype(jnp.float32) - ref2)))
    assert err2 < 5e-2, f"test2 max abs err vs reference: {err2}"

    print("KERNEL_OK")
</pallas_src>

<mosaic_0001>
module attributes {stable_mosaic.version = 11 : i64} {
  func.func @_mlp_kernel(%arg0: i32, %arg1: i32, %arg2: i32, %arg3: memref<1x16x256xf32, #tpu.memory_space<vmem>>, %arg4: memref<32x16xbf16, #tpu.memory_space<vmem>>, %arg5: memref<32x1xf32, #tpu.memory_space<vmem>>, %arg6: memref<16x32xbf16, #tpu.memory_space<vmem>>, %arg7: memref<16x1xf32, #tpu.memory_space<vmem>>, %arg8: memref<1x16x256xf32, #tpu.memory_space<vmem>>, %arg9: memref<16x256xf32, #tpu.memory_space<vmem>>) attributes {dimension_semantics = [#tpu.dimension_semantics<parallel>, #tpu.dimension_semantics<parallel>, #tpu.dimension_semantics<arbitrary>], iteration_bounds = array<i64: 2, 1, 1>, scalar_prefetch = 0 : i64, scratch_operands = 1 : i64, tpu.core_type = #tpu.core_type<tc>, window_params = [{transform_indices = @transform_0, window_bounds = array<i64: 1, 16, 256>}, {transform_indices = @transform_1, window_bounds = array<i64: 32, 16>}, {transform_indices = @transform_2, window_bounds = array<i64: 32, 1>}, {transform_indices = @transform_3, window_bounds = array<i64: 16, 32>}, {pipeline_mode = #tpu.pipeline_mode<synchronous>, transform_indices = @transform_4, window_bounds = array<i64: 16, 1>}, {transform_indices = @transform_5, window_bounds = array<i64: 1, 16, 256>}]} {
    %c0_i32 = arith.constant 0 : i32
    %0 = arith.cmpi eq, %arg2, %c0_i32 : i32
    %1 = arith.extui %0 : i1 to i32
    %c0_i32_0 = arith.constant 0 : i32
    %2 = arith.cmpi ne, %1, %c0_i32_0 : i32
    scf.if %2 {
      %cst_31 = arith.constant 0.000000e+00 : f32
      %60 = vector.broadcast %cst_31 : f32 to vector<16x256xf32>
      %c0_32 = arith.constant 0 : index
      %c0_33 = arith.constant 0 : index
      %61 = vector.load %arg9[%c0_32, %c0_33] : memref<16x256xf32, #tpu.memory_space<vmem>>, vector<16x256xf32>
      tpu.vector_store %arg9[%c0_32, %c0_33], %60 {strides = array<i32>} : memref<16x256xf32, #tpu.memory_space<vmem>>, vector<16x256xf32>,
    } else {
    }
    %c0 = arith.constant 0 : index
    %c0_1 = arith.constant 0 : index
    %c0_2 = arith.constant 0 : index
    %3 = vector.load %arg3[%c0, %c0_1, %c0_2] : memref<1x16x256xf32, #tpu.memory_space<vmem>>, vector<1x16x256xf32>
    %4 = vector.shape_cast %3 : vector<1x16x256xf32> to vector<16x256xf32>
    %5 = arith.truncf %4 : vector<16x256xf32> to vector<16x256xbf16>
    %c0_3 = arith.constant 0 : index
    %c0_4 = arith.constant 0 : index
    %6 = vector.load %arg4[%c0_3, %c0_4] : memref<32x16xbf16, #tpu.memory_space<vmem>>, vector<32x16xbf16>
    %cst = arith.constant dense<0.000000e+00> : vector<32x256xf32>
    %7 = tpu.matmul %6, %5, %cst {dimension_numbers = #tpu.dot_dimension_numbers<[1], [0], [0], [1], [0, 0, 1, 1], [], []>} : vector<32x16xbf16>, vector<16x256xbf16>, vector<32x256xf32> -> vector<32x256xf32>
    %c0_5 = arith.constant 0 : index
    %c0_6 = arith.constant 0 : index
    %8 = vector.load %arg5[%c0_5, %c0_6] : memref<32x1xf32, #tpu.memory_space<vmem>>, vector<32x1xf32>
    %9 = vector.broadcast %8 : vector<32x1xf32> to vector<32x256xf32>
    %10 = arith.addf %7, %9 : vector<32x256xf32>
    %cst_7 = arith.constant 5.000000e-01 : f32
    %11 = vector.broadcast %cst_7 : f32 to vector<32x256xf32>
    %12 = arith.mulf %11, %10 : vector<32x256xf32>
    %cst_8 = arith.constant 0.707106769 : f32
    %13 = vector.broadcast %cst_8 : f32 to vector<32x256xf32>
    %14 = arith.mulf %10, %13 : vector<32x256xf32>
    %cst_9 = arith.constant 0.000000e+00 : f32
    %15 = vector.broadcast %cst_9 : f32 to vector<32x256xf32>
    %16 = arith.cmpf oge, %14, %15 : vector<32x256xf32>
    %cst_10 = arith.constant 1.000000e+00 : f32
    %cst_11 = arith.constant -1.000000e+00 : f32
    %17 = vector.broadcast %cst_10 : f32 to vector<32x256xf32>
    %18 = vector.broadcast %cst_11 : f32 to vector<32x256xf32>
    %19 = arith.select %16, %17, %18 : vector<32x256xi1>, vector<32x256xf32>
    %20 = math.absf %14 : vector<32x256xf32>
    %cst_12 = arith.constant 0.327591091 : f32
    %21 = vector.broadcast %cst_12 : f32 to vector<32x256xf32>
    %22 = arith.mulf %21, %20 : vector<32x256xf32>
    %cst_13 = arith.constant 1.000000e+00 : f32
    %23 = vector.broadcast %cst_13 : f32 to vector<32x256xf32>
    %24 = arith.addf %23, %22 : vector<32x256xf32>
    %25 = tpu.reciprocal %24 {approx = true} : vector<32x256xf32> -> vector<32x256xf32>
    %cst_14 = arith.constant 1.06140542 : f32
    %26 = vector.broadcast %cst_14 : f32 to vector<32x256xf32>
    %27 = arith.mulf %25, %26 : vector<32x256xf32>
    %cst_15 = arith.constant -1.45315206 : f32
    %28 = vector.broadcast %cst_15 : f32 to vector<32x256xf32>
    %29 = arith.addf %28, %27 : vector<32x256xf32>
    %30 = arith.mulf %25, %29 : vector<32x256xf32>
    %cst_16 = arith.constant 1.42141378 : f32
    %31 = vector.broadcast %cst_16 : f32 to vector<32x256xf32>
    %32 = arith.addf %31, %30 : vector<32x256xf32>
    %33 = arith.mulf %25, %32 : vector<32x256xf32>
    %cst_17 = arith.constant -0.284496725 : f32
    %34 = vector.broadcast %cst_17 : f32 to vector<32x256xf32>
    %35 = arith.addf %34, %33 : vector<32x256xf32>
    %36 = arith.mulf %25, %35 : vector<32x256xf32>
    %cst_18 = arith.constant 0.254829586 : f32
    %37 = vector.broadcast %cst_18 : f32 to vector<32x256xf32>
    %38 = arith.addf %37, %36 : vector<32x256xf32>
    %39 = arith.mulf %25, %38 : vector<32x256xf32>
    %40 = arith.mulf %20, %20 : vector<32x256xf32>
    %cst_19 = arith.constant 0.000000e+00 : f32
    %41 = vector.broadcast %cst_19 : f32 to vector<32x256xf32>
    %42 = arith.subf %41, %40 : vector<32x256xf32>
    %43 = math.exp %42 : vector<32x256xf32>
    %44 = arith.mulf %39, %43 : vector<32x256xf32>
    %cst_20 = arith.constant 1.000000e+00 : f32
    %45 = vector.broadcast %cst_20 : f32 to vector<32x256xf32>
    %46 = arith.subf %45, %44 : vector<32x256xf32>
    %47 = arith.mulf %19, %46 : vector<32x256xf32>
    %cst_21 = arith.constant 1.000000e+00 : f32
    %48 = vector.broadcast %cst_21 : f32 to vector<32x256xf32>
    %49 = arith.addf %48, %47 : vector<32x256xf32>
    %50 = arith.mulf %12, %49 : vector<32x256xf32>
    %c0_22 = arith.constant 0 : index
    %c0_23 = arith.constant 0 : index
    %51 = vector.load %arg9[%c0_22, %c0_23] : memref<16x256xf32, #tpu.memory_space<vmem>>, vector<16x256xf32>
    %c0_24 = arith.constant 0 : index
    %c0_25 = arith.constant 0 : index
    %52 = vector.load %arg6[%c0_24, %c0_25] : memref<16x32xbf16, #tpu.memory_space<vmem>>, vector<16x32xbf16>
    %53 = arith.truncf %50 : vector<32x256xf32> to vector<32x256xbf16>
    %cst_26 = arith.constant dense<0.000000e+00> : vector<16x256xf32>
    %54 = tpu.matmul %52, %53, %cst_26 {dimension_numbers = #tpu.dot_dimension_numbers<[1], [0], [0], [1], [0, 0, 1, 1], [], []>} : vector<16x32xbf16>, vector<32x256xbf16>, vector<16x256xf32> -> vector<16x256xf32>
    %55 = arith.addf %51, %54 : vector<16x256xf32>
    %c0_27 = arith.constant 0 : index
    %c0_28 = arith.constant 0 : index
    %56 = vector.load %arg9[%c0_27, %c0_28] : memref<16x256xf32, #tpu.memory_space<vmem>>, vector<16x256xf32>
    tpu.vector_store %arg9[%c0_27, %c0_28], %55 {strides = array<i32>} : memref<16x256xf32, #tpu.memory_space<vmem>>, vector<16x256xf32>,
    %c0_i32_29 = arith.constant 0 : i32
    %57 = arith.cmpi eq, %arg2, %c0_i32_29 : i32
    %58 = arith.extui %57 : i1 to i32
    %c0_i32_30 = arith.constant 0 : i32
    %59 = arith.cmpi ne, %58, %c0_i32_30 : i32
    scf.if %59 {
      %c0_31 = arith.constant 0 : index
      %c0_32 = arith.constant 0 : index
      %60 = vector.load %arg9[%c0_31, %c0_32] : memref<16x256xf32, #tpu.memory_space<vmem>>, vector<16x256xf32>
      %c0_33 = arith.constant 0 : index
      %c0_34 = arith.constant 0 : index
      %61 = vector.load %arg7[%c0_33, %c0_34] : memref<16x1xf32, #tpu.memory_space<vmem>>, vector<16x1xf32>
      %62 = vector.broadcast %61 : vector<16x1xf32> to vector<16x256xf32>
      %63 = arith.addf %60, %62 : vector<16x256xf32>
      %c0_35 = arith.constant 0 : index
      %c0_36 = arith.constant 0 : index
      %c0_37 = arith.constant 0 : index
      %64 = vector.load %arg8[%c0_35, %c0_36, %c0_37] : memref<1x16x256xf32, #tpu.memory_space<vmem>>, vector<1x16x256xf32>
      %65 = vector.shape_cast %64 : vector<1x16x256xf32> to vector<16x256xf32>
      %66 = vector.shape_cast %63 : vector<16x256xf32> to vector<1x16x256xf32>
      tpu.vector_store %arg8[%c0_35, %c0_36, %c0_37], %66 {strides = array<i32>} : memref<1x16x256xf32, #tpu.memory_space<vmem>>, vector<1x16x256xf32>,
    } else {
    }
    return
  }
  func.func @transform_0(%arg0: i32, %arg1: i32, %arg2: i32) -> (i32, i32, i32) {
    %c0_i32 = arith.constant 0 : i32
    %c0_i32_0 = arith.constant 0 : i32
    return %arg0, %c0_i32, %arg1 : i32, i32, i32
  }
  func.func @transform_1(%arg0: i32, %arg1: i32, %arg2: i32) -> (i32, i32) {
    %c0_i32 = arith.constant 0 : i32
    %c0_i32_0 = arith.constant 0 : i32
    return %arg2, %c0_i32 : i32, i32
  }
  func.func @transform_2(%arg0: i32, %arg1: i32, %arg2: i32) -> (i32, i32) {
    %c0_i32 = arith.constant 0 : i32
    %c0_i32_0 = arith.constant 0 : i32
    return %arg2, %c0_i32 : i32, i32
  }
  func.func @transform_3(%arg0: i32, %arg1: i32, %arg2: i32) -> (i32, i32) {
    %c0_i32 = arith.constant 0 : i32
    %c0_i32_0 = arith.constant 0 : i32
    return %c0_i32, %arg2 : i32, i32
  }
  func.func @transform_4(%arg0: i32, %arg1: i32, %arg2: i32) -> (i32, i32) {
    %c0_i32 = arith.constant 0 : i32
    %c0_i32_0 = arith.constant 0 : i32
    %c0_i32_1 = arith.constant 0 : i32
    return %c0_i32, %c0_i32_0 : i32, i32
  }
  func.func @transform_5(%arg0: i32, %arg1: i32, %arg2: i32) -> (i32, i32, i32) {
    %c0_i32 = arith.constant 0 : i32
    %c0_i32_0 = arith.constant 0 : i32
    return %arg0, %c0_i32, %arg1 : i32, i32, i32
  }
}

</mosaic_0001>

<bundles_post_ra>
// kernel: tpu_custom_call.1
= control target key start
LH: loop header
LB: loop body
LE: loop exit
PB: predicated region body
PF: predicated region fallthrough
CT: control target
= control target key end

     0   :  { %10 = vsyncpa [#allocation4], 0  ;;  %s1385_s0 = inlined_call_operand.vmem [shape: f32[2,16,256], index: 0, kind: input, shape index: {}]   ;;  %s1386_s1 = inlined_call_operand.vmem [shape: bf16[32,16], index: 1, kind: input, shape index: {}]   ;;  %s1387_s2 = inlined_call_operand.vmem [shape: f32[32,1], index: 2, kind: input, shape index: {}]   ;;  %s1388_s3 = inlined_call_operand.vmem [shape: bf16[16,32], index: 3, kind: input, shape index: {}]   ;;  %s1389_s4 = inlined_call_operand.vmem [shape: f32[16,1], index: 4, kind: input, shape index: {}]   ;;  %s1390_s5 = inlined_call_operand.hbm [shape: f32[2,16,256], index: 5, kind: output, shape index: {}]  }
   0x1   :  { %12 = vsyncpa [#allocation4 + $0x1], 0  ;;  %s1116_s18 = smov 0   ;;  %s1118_s19 = smov 0  }
   0x2   :  { %s1120_s20 = smov 0   ;;  %s1122_s21 = smov 0  }
   0x3   :  { %s1124_s22 = smov 0   ;;  %s1126_s23 = smov 0  }
   0x4 LB: > { %s883_s24 = sadd.s32 4294967295, %s1079_s23   ;;  %s884_s25 = sadd.s32 4294967294, %s1079_s23   ;;  %s1079_s23 = sphi %s1126_s23, %s18_s23   ;;  %s1075_s22 = sphi %s1124_s22, %s1397_s22   ;;  %s1071_s21 = sphi %s1122_s21, %s1396_s21   ;;  %s1067_s20 = sphi %s1120_s20, %s1395_s20   ;;  %s1063_s19 = sphi %s1118_s19, %s1394_s19   ;;  %s1059_s18 = sphi %s1116_s18, %s1393_s18  }
   0x5   : > { %s37_s26 = sadd.s32 1, %s1075_s22  ;;  %s173_s27 = sadd.s32 1, %s1067_s20 }
   0x6   : > { %p39_p0 = scmp.ge.s32.totalorder %s37_s26, 2  ;;  %p183_p1 = scmp.ne.s32.totalorder %s1067_s20, %s1063_s19 }
   0x7   : > { %p184_p2 = scmp.eq.s32.totalorder %s883_s24, 1  ;;  %p189_p3 = scmp.ne.s32.totalorder %s1063_s19, %s1059_s18 }
   0x8   : > { %s1399_s26 = smov (%p39_p0, %s37_s26), 0  ;;  %p190_p5 = scmp.eq.s32.totalorder %s884_s25, 1 }
   0x9   : > { %p1156_p4 = por %p184_p2, %p183_p1  ;;  %s168_s29 = ssub.s32 %s1075_s22, %s1399_s26 }
   0xa   : > { %p890_p6 = scmp.ge.s32.totalorder %s1079_s23, 1  ;;  %p171_p7 = scmp.eq.s32.totalorder %s168_s29, 0 }
   0xb   : > { %p1163_p8 = por %p190_p5, %p189_p3  ;;  %p249_p9 = scmp.lt.s32.totalorder %s1079_s23, 3 }
   0xc   : > { %s1169_s6 = scalar_select %p171_p7, %s1067_s20, %s173_s27  }
   0xd   : > { %p250_p10 = pnand %p890_p6, %p249_p9 }
   0xe   : > { %p296_p11 = scmp.lt.s32.totalorder (!%p250_p10), %s1071_s21, 1  ;;  %s292_s15 = sand.u32 (!%p250_p10), 1, %s1063_s19  }
   0xf   : > { %253 = sbr.rel (%p250_p10) target bundleno = 517 (0x205), region = 40  ;;  %s891_s16 = sshll.u32 (!%p250_p10), %s292_s15, 5 }
  0x10   : > { %s294_s17 = scalar_lea.vmem (!%p250_p10), [#allocation3], %s891_s16  ;;  %s1340_s8 = scalar_lea.sflag (!%p250_p10), [#allocation4], %s292_s15 }
  0x11   : > { %s756_s24 = sshll.u32 (!%p250_p10), %s294_s17, 4  ;;  %s1333_s24 = int_to_ptr.vmem [resolvable:$true] %s756_s24 }
  0x12   : > { %s1003_s9 = scalar_lea.vmem (!%p250_p10), %s1333_s24, 512 }
  0x13   : > { %p1004_p12 = scmp.ne.s32.totalorder (!%p250_p10), %s1333_s24, %s1003_s9 }
  0x14   : > { %v1081_v0 = vmov 0   ;;  %s297_s7 = scalar_select %p296_p11, %s1071_s21, 1  ;;  %v341_v1 = vld [vmem:[%s1387_s2] sm:$0xff]  ;;  %v343_v2 = vld [vmem:[%s1387_s2 + $0x10] sm:$0xff]  ;;  %v342_v3 = vld [vmem:[%s1387_s2 + $0x8] sm:$0xff]  ;;  %vm375_vm0 = vcmask 130048  }
  0x15   : > { %414 = vmatprep.mubr.bf16.mxu0 %v1081_v0  ;;  %967 = vset.pattern.permute.xlu1 %v1081_v0  ;;  %v344_v4 = vld [vmem:[%s1387_s2 + $0x18] sm:$0xff]  ;;  %v720_v11 = vld [vmem:[%s1389_s4] sm:$0xff]  ;;  %v721_v12 = vld [vmem:[%s1389_s4 + $0x8] sm:$0xff]  ;;  %vm658_vm9 = vcmask 261120   ;;  %p1005_p13 = pnand %p1004_p12, %p1156_p4 }
  0x16   : > { %966 = vset.pattern.permute.xlu0 %v1081_v0  ;;  %694 = vmatprep.mubr.bf16.mxu1 %v1081_v0  ;;  %s905_s14 = sshll.u32 %s297_s7, 5  ;;  %v968_v13 = vld [vmem:[%s1386_s1] sm:$0xff]   ;;  %v969_v14 = vld [vmem:[%s1386_s1 + $0x8] sm:$0xff]  }
  0x17   : > { %347 = vperm.xlu1 %967, %v341_v1   ;;  %357 = vperm.xlu0 %966, %v343_v2   ;;  %s303_s25 = scalar_lea.vmem %s1385_s0, %s905_s14  ;;  %p1006_p0 = pneg %p1005_p13 }
  0x18   : > { %v332_v5 = vld [vmem:[%s303_s25 + $0x8] sm:$0xff]  ;;  %v334_v6 = vld [vmem:[%s303_s25 + $0x18] sm:$0xff]  ;;  %v331_v7 = vld [vmem:[%s303_s25] sm:$0xff] }
  0x19   : > { %v336_v8 = vpack.c.bf16 %v334_v6, %v332_v5  ;;  %v333_v9 = vld [vmem:[%s303_s25 + $0x10] sm:$0xff]  ;;  %s906_s25 = sshll.u32 %s1071_s21, 9  ;;  %s1083_s21 = smov [#allocation3]  }
  0x1a   : > { %v335_v10 = vpack.c.bf16 %v333_v9, %v331_v7  ;;  %s1338_s7 = scalar_lea.hbm %s1390_s5, %s906_s25  ;;  %s1007_s10 = sshll.u32 %s1083_s21, 4  ;;  %s1008_s10 = int_to_ptr.vmem [resolvable:$false] %s1007_s10 }
  0x1b   : > { %352 = vperm.xlu1 %967, %v342_v3   ;;  %362 = vperm.xlu0 %966, %v344_v4   ;;  %s1009_s11 = scalar_lea.vmem %s1008_s10, 1024  ;;  %p1010_p1 = scmp.lt.s32.totalorder %s1333_s24, %s1008_s10 }
  0x1c   : > { %396 = vmatprep.subr.bf16.mxu0 %v336_v8  ;;  %p1011_p2 = scmp.lt.s32.totalorder %s1009_s11, %s1003_s9 }
  0x1d   : > { %397 = vmatpush1.bf16.msra.mxu0 %v335_v10 }
  0x1e   : > { %p1012_p3 = por %p1011_p2, %p1010_p1 }
  0x1f   : > { %724 = vperm.xlu0 %966, %v720_v11   ;;  %729 = vperm.xlu1 %967, %v721_v12  }
  0x20   : > { %896 = vmatmul.mubr.msk.bf16.vlgmr.msra.gmra.mxu0 %vm375_vm0, %v968_v13  ;;  %p1013_p5 = pnand %p1012_p3, %p1006_p0 }
  0x21   : > { %424 = vmatprep.mubr.bf16.mxu0 %v1081_v0 }
  0x28   : > { %897 = vmatmul.mubr.msk.bf16.gmra.mxu0 %vm375_vm0, %v969_v14 }
  0x92   : > { %v348_v15 = vpop.permute.xlu1 %347  ;;  %v358_v37 = vpop.permute.xlu0 %357 }
  0x96   : > { %v353_v21 = vpop.permute.xlu1 %352  ;;  %v363_v47 = vpop.permute.xlu0 %362 }
  0xe0   : > { %v416_v16 = vpop.f32.mrf.mxu0 }
  0xe1   : > { %v1200_v17 = vadd.f32 %v416_v16, %v348_v15 }
  0xe2   : > { %v418_v18 = vpop.f32.mrf.mxu0 }
  0xe3   : > { %v1203_v19 = vmul.f32 0.70710677, %v1200_v17  ;;  %v1205_v20 = vadd.f32 %v418_v18, %v348_v15 }
  0xe4   : > { %v420_v22 = vpop.f32.mrf.mxu0 }
  0xe5   : > { %v467_v23 = vand.u32 2147483647, %v1203_v19  ;;  %v1209_v24 = vmul.f32 0.70710677, %v1205_v20  ;;  %v1211_v25 = vadd.f32 %v420_v22, %v353_v21  ;;  %vm451_vm2 = vcmp.ge.f32.partialorder %v1203_v19, 0.0 }
  0xe6   : > { %v422_v26 = vpop.f32.mrf.mxu0 }
  0xe7   : > { %v475_v27 = vmul.f32 0.3275911, %v467_v23  ;;  %v468_v28 = vand.u32 2147483647, %v1209_v24  ;;  %v1215_v29 = vmul.f32 0.70710677, %v1211_v25  ;;  %v1217_v30 = vadd.f32 %v422_v26, %v353_v21 }
  0xe8   : > { %v426_v31 = vpop.f32.mrf.mxu0  ;;  %v571_v57 = vmul.f32 %v467_v23, %v467_v23  ;;  %vm452_vm1 = vcmp.ge.f32.partialorder %v1209_v24, 0.0 }
  0xe9   : > { %v483_v32 = vadd.f32 1.0, %v475_v27  ;;  %v476_v33 = vmul.f32 0.3275911, %v468_v28  ;;  %v469_v34 = vand.u32 2147483647, %v1215_v29  ;;  %v1224_v42 = vadd.f32 %v426_v31, %v358_v37 }
  0xea   : > { %v1221_v35 = vmul.f32 0.70710677, %v1217_v30  ;;  %v428_v36 = vpop.f32.mrf.mxu0  ;;  %v572_v1 = vmul.f32 %v468_v28, %v468_v28  ;;  %v579_v3 = vsub.f32 0.0, %v571_v57  ;;  %vm453_vm3 = vcmp.ge.f32.partialorder %v1215_v29, 0.0 }
  0xeb   : > { %971 = vrcp.f32 %v483_v32  ;;  %v484_v38 = vadd.f32 1.0, %v476_v33  ;;  %v477_v39 = vmul.f32 0.3275911, %v469_v34  ;;  %v1226_v45 = vadd.f32 %v428_v36, %v358_v37 }
  0xec   : > { %v470_v40 = vand.u32 2147483647, %v1221_v35  ;;  %v430_v43 = vpop.f32.mrf.mxu0  ;;  %v1229_v46 = vmul.f32 0.70710677, %v1224_v42  ;;  %v573_v6 = vmul.f32 %v469_v34, %v469_v34  ;;  %v580_v13 = vsub.f32 0.0, %v572_v1 }
  0xed   : > { %973 = vrcp.f32 %v484_v38  ;;  %v485_v41 = vadd.f32 1.0, %v477_v39  ;;  %v1232_v49 = vmul.f32 0.70710677, %v1226_v45  ;;  %v1235_v51 = vadd.f32 %v430_v43, %v363_v47 }
  0xee   : > { %v478_v44 = vmul.f32 0.3275911, %v470_v40  ;;  %v471_v50 = vand.u32 2147483647, %v1229_v46  ;;  %v432_v52 = vpop.f32.mrf.mxu0  ;;  %v574_v7 = vmul.f32 %v470_v40, %v470_v40  ;;  %v587_v18 = vmul.f32 1.442695, %v579_v3 }
  0xef   : > { %975 = vrcp.f32 %v485_v41  ;;  %v472_v54 = vand.u32 2147483647, %v1232_v49  ;;  %v1239_v55 = vmul.f32 0.70710677, %v1235_v51  ;;  %v1241_v56 = vadd.f32 %v432_v52, %v363_v47 }
  0xf0   : > { %v486_v48 = vadd.f32 1.0, %v478_v44  ;;  %v479_v53 = vmul.f32 0.3275911, %v471_v50  ;;  %v581_v21 = vsub.f32 0.0, %v573_v6  ;;  %v582_v22 = vsub.f32 0.0, %v574_v7 }
  0xf1   : > { %v480_v59 = vmul.f32 0.3275911, %v472_v54  ;;  %v473_v60 = vand.u32 2147483647, %v1239_v55  ;;  %v1245_v61 = vmul.f32 0.70710677, %v1241_v56  ;;  %v575_v23 = vmul.f32 %v471_v50, %v471_v50 }
  0xf2   : > { %977 = vrcp.f32 %v486_v48  ;;  %v487_v58 = vadd.f32 1.0, %v479_v53  ;;  %v576_v31 = vmul.f32 %v472_v54, %v472_v54  ;;  %v589_v33 = vmul.f32 1.442695, %v580_v13 }
  0xf3   : > { %v488_v63 = vadd.f32 1.0, %v480_v59  ;;  %v481_v2 = vmul.f32 0.3275911, %v473_v60  ;;  %v474_v4 = vand.u32 2147483647, %v1245_v61  ;;  %v577_v36 = vmul.f32 %v473_v60, %v473_v60 }
  0xf4   : > { %979 = vrcp.f32 %v487_v58  ;;  %v591_v39 = vmul.f32 1.442695, %v581_v21  ;;  %v583_v41 = vsub.f32 0.0, %v575_v23  ;;  %v593_v44 = vmul.f32 1.442695, %v582_v22 }
  0xf5   : > { %981 = vrcp.f32 %v488_v63  ;;  %v489_v8 = vadd.f32 1.0, %v481_v2  ;;  %v482_v10 = vmul.f32 0.3275911, %v474_v4  ;;  %v584_v47 = vsub.f32 0.0, %v576_v31 }
  0xf6   : > { %v585_v53 = vsub.f32 0.0, %v577_v36  ;;  %v578_v58 = vmul.f32 %v474_v4, %v474_v4  ;;  %v595_v63 = vmul.f32 1.442695, %v583_v41  ;;  %vm454_vm4 = vcmp.ge.f32.partialorder %v1221_v35, 0.0 }
  0xf7   : > { %983 = vrcp.f32 %v489_v8  ;;  %v490_v16 = vadd.f32 1.0, %v482_v10  ;;  %v597_v1 = vmul.f32 1.442695, %v584_v47  ;;  %vm455_vm5 = vcmp.ge.f32.partialorder %v1229_v46, 0.0 }
  0xf8   : > { %v1247_v62 = vpop.eup %971  ;;  %v599_v7 = vmul.f32 1.442695, %v585_v53  ;;  %vm456_vm6 = vcmp.ge.f32.partialorder %v1232_v49, 0.0  ;;  %vm457_vm7 = vcmp.ge.f32.partialorder %v1239_v55, 0.0  ;;  %vm458_vm8 = vcmp.ge.f32.partialorder %v1245_v61, 0.0 }
  0xf9   : > { %v499_v0 = vmul.f32 1.0614054, %v1247_v62  ;;  %985 = vrcp.f32 %v490_v16  ;;  %v438_v24 = vmul.f32 0.5, %v1217_v30  ;;  %v440_v29 = vmul.f32 0.5, %v1226_v45 }
  0xfa   : > { %v1251_v5 = vpop.eup %973  ;;  %987 = vpow2.f32 %v587_v18  ;;  %v437_v30 = vmul.f32 0.5, %v1211_v25  ;;  %v435_v45 = vmul.f32 0.5, %v1200_v17  ;;  %v725_v25 = vpop.permute.xlu0 %724 }
  0xfb   : > { %v500_v9 = vmul.f32 1.0614054, %v1251_v5  ;;  %v507_v12 = vadd.f32 -1.4531521, %v499_v0  ;;  %989 = vpow2.f32 %v589_v33 }
  0xfc   : > { %v1254_v11 = vpop.eup %975  ;;  %991 = vpow2.f32 %v591_v39 }
  0xfd   : > { %v508_v14 = vadd.f32 -1.4531521, %v500_v9  ;;  %v501_v15 = vmul.f32 1.0614054, %v1254_v11  ;;  %v515_v32 = vmul.f32 %v1247_v62, %v507_v12  ;;  %993 = vpow2.f32 %v593_v44 }
  0xfe   : > { %v586_v12 = vsub.f32 0.0, %v578_v58  ;;  %995 = vpow2.f32 %v595_v63 }
  0xff   : > { %v1257_v26 = vpop.eup %977  ;;  %v516_v27 = vmul.f32 %v1251_v5, %v508_v14  ;;  %v509_v28 = vadd.f32 -1.4531521, %v501_v15  ;;  %v523_v50 = vadd.f32 1.4214138, %v515_v32  ;;  %997 = vpow2.f32 %v597_v1 }
 0x100   : > { %v502_v34 = vmul.f32 1.0614054, %v1257_v26  ;;  %v601_v32 = vmul.f32 1.442695, %v586_v12  ;;  %999 = vpow2.f32 %v599_v7 }
 0x101   : > { %v524_v37 = vadd.f32 1.4214138, %v516_v27  ;;  %v517_v38 = vmul.f32 %v1254_v11, %v509_v28  ;;  %v1263_v48 = vpop.eup %979  ;;  %v531_v3 = vmul.f32 %v1247_v62, %v523_v50 }
 0x102   : > { %v510_v40 = vadd.f32 -1.4531521, %v502_v34  ;;  %v503_v59 = vmul.f32 1.0614054, %v1263_v48  ;;  %v1269_v0 = vpop.eup %981  ;;  %1001 = vpow2.f32 %v601_v32 }
 0x103   : > { %v525_v43 = vadd.f32 1.4214138, %v517_v38  ;;  %v532_v54 = vmul.f32 %v1251_v5, %v524_v37  ;;  %v504_v8 = vmul.f32 1.0614054, %v1269_v0  ;;  %v539_v22 = vadd.f32 -0.28449672, %v531_v3 }
 0x104   : > { %v518_v52 = vmul.f32 %v1257_v26, %v510_v40  ;;  %v511_v2 = vadd.f32 -1.4531521, %v503_v59  ;;  %v1274_v9 = vpop.eup %983 }
 0x105   : > { %v533_v57 = vmul.f32 %v1254_v11, %v525_v43  ;;  %v540_v4 = vadd.f32 -0.28449672, %v532_v54  ;;  %v512_v15 = vadd.f32 -1.4531521, %v504_v8  ;;  %v505_v16 = vmul.f32 1.0614054, %v1274_v9 }
 0x106   : > { %v526_v60 = vadd.f32 1.4214138, %v518_v52  ;;  %v519_v13 = vmul.f32 %v1263_v48, %v511_v2  ;;  %v1278_v21 = vpop.eup %985  ;;  %v547_v44 = vmul.f32 %v1247_v62, %v539_v22 }
 0x107   : > { %v541_v10 = vadd.f32 -0.28449672, %v533_v57  ;;  %v520_v27 = vmul.f32 %v1269_v0, %v512_v15  ;;  %v513_v28 = vadd.f32 -1.4531521, %v505_v16  ;;  %v548_v31 = vmul.f32 %v1251_v5, %v540_v4  ;;  %v988_v43 = vpop.eup %987 }
 0x108   : > { %v534_v6 = vmul.f32 %v1257_v26, %v526_v60  ;;  %v527_v18 = vadd.f32 1.4214138, %v519_v13  ;;  %v506_v33 = vmul.f32 1.0614054, %v1278_v21  ;;  %v990_v52 = vpop.eup %989  ;;  %v555_v7 = vadd.f32 0.2548296, %v547_v44 }
 0x109   : > { %v549_v36 = vmul.f32 %v1254_v11, %v541_v10  ;;  %v528_v37 = vadd.f32 1.4214138, %v520_v27  ;;  %v521_v38 = vmul.f32 %v1274_v9, %v513_v28  ;;  %v556_v53 = vadd.f32 0.2548296, %v548_v31  ;;  %v992_v63 = vpop.eup %991 }
 0x10a   : > { %v542_v14 = vadd.f32 -0.28449672, %v534_v6  ;;  %v535_v34 = vmul.f32 %v1263_v48, %v527_v18  ;;  %v514_v40 = vadd.f32 -1.4531521, %v506_v33  ;;  %v994_v6 = vpop.eup %993  ;;  %v563_v27 = vmul.f32 %v1247_v62, %v555_v7 }
 0x10b   : > { %v536_v47 = vmul.f32 %v1269_v0, %v528_v37  ;;  %v529_v50 = vadd.f32 1.4214138, %v521_v38  ;;  %v557_v58 = vadd.f32 0.2548296, %v549_v36  ;;  %v564_v10 = vmul.f32 %v1251_v5, %v556_v53  ;;  %v996_v18 = vpop.eup %995 }
 0x10c   : > { %v550_v23 = vmul.f32 %v1257_v26, %v542_v14  ;;  %v543_v41 = vadd.f32 -0.28449672, %v535_v34  ;;  %v522_v54 = vmul.f32 %v1278_v21, %v514_v40  ;;  %v1082_v44 = vmov -1.0  }
 0x10d   : > { %v544_v59 = vadd.f32 -0.28449672, %v536_v47  ;;  %v537_v60 = vmul.f32 %v1274_v9, %v529_v50  ;;  %v565_v14 = vmul.f32 %v1254_v11, %v557_v58  ;;  %v462_v47 = vsel %vm454_vm4, 1.0, %v1082_v44 }
 0x10e   : > { %v558_v39 = vadd.f32 0.2548296, %v550_v23  ;;  %v551_v57 = vmul.f32 %v1263_v48, %v543_v41  ;;  %v530_v2 = vadd.f32 1.4214138, %v522_v54  ;;  %v998_v23 = vpop.eup %997  ;;  %v463_v46 = vsel %vm455_vm5, 1.0, %v1082_v44 }
 0x10f   : > { %v552_v8 = vmul.f32 %v1269_v0, %v544_v59  ;;  %v545_v4 = vadd.f32 -0.28449672, %v537_v60  ;;  %v605_v32 = vmul.f32 %v992_v63, %v565_v14  ;;  %v1000_v36 = vpop.eup %999  ;;  %v465_v53 = vsel %vm457_vm7, 1.0, %v1082_v44 }
 0x110   : > { %v566_v1 = vmul.f32 %v1257_v26, %v558_v39  ;;  %v559_v3 = vadd.f32 0.2548296, %v551_v57  ;;  %v538_v12 = vmul.f32 %v1278_v21, %v530_v2  ;;  %v464_v54 = vsel %vm456_vm6, 1.0, %v1082_v44 }
 0x111   : > { %v560_v15 = vadd.f32 0.2548296, %v552_v8  ;;  %v553_v16 = vmul.f32 %v1274_v9, %v545_v4  ;;  %v460_v59 = vsel %vm452_vm1, 1.0, %v1082_v44  ;;  %v459_v7 = vsel %vm451_vm2, 1.0, %v1082_v44 }
 0x112   : > { %v567_v13 = vmul.f32 %v1263_v48, %v559_v3  ;;  %v606_v26 = vmul.f32 %v994_v6, %v566_v1  ;;  %v546_v22 = vadd.f32 -0.28449672, %v538_v12  ;;  %v604_v48 = vmul.f32 %v990_v52, %v564_v10 }
 0x113   : > { %v568_v5 = vmul.f32 %v1269_v0, %v560_v15  ;;  %v561_v28 = vadd.f32 0.2548296, %v553_v16  ;;  %v603_v0 = vmul.f32 %v988_v43, %v563_v27  ;;  %v613_v52 = vsub.f32 1.0, %v605_v32 }
 0x114   : > { %v607_v31 = vmul.f32 %v996_v18, %v567_v13  ;;  %v554_v11 = vmul.f32 %v1278_v21, %v546_v22  ;;  %v614_v37 = vsub.f32 1.0, %v606_v26  ;;  %v612_v41 = vsub.f32 1.0, %v604_v48 }
 0x115   : > { %v608_v33 = vmul.f32 %v998_v23, %v568_v5  ;;  %v569_v34 = vmul.f32 %v1274_v9, %v561_v28  ;;  %v1002_v9 = vpop.eup %1001  ;;  %v611_v58 = vsub.f32 1.0, %v603_v0  ;;  %v466_v3 = vsel %vm458_vm8, 1.0, %v1082_v44 }
 0x116   : > { %v562_v62 = vadd.f32 0.2548296, %v554_v11  ;;  %v615_v40 = vsub.f32 1.0, %v607_v31  ;;  %v622_v57 = vmul.f32 %v614_v37, %v462_v47  ;;  %v620_v63 = vmul.f32 %v612_v41, %v460_v59 }
 0x117   : > { %v616_v38 = vsub.f32 1.0, %v608_v33  ;;  %v609_v39 = vmul.f32 %v1000_v36, %v569_v34  ;;  %v619_v10 = vmul.f32 %v611_v58, %v459_v7  ;;  %v441_v12 = vmul.f32 0.5, %v1235_v51  ;;  %v970_v33 = vld [vmem:[%s1388_s3] sm:$0xff]  }
 0x118   : > { %v570_v50 = vmul.f32 %v1278_v21, %v562_v62  ;;  %v623_v60 = vmul.f32 %v615_v40, %v463_v46  ;;  %v461_v21 = vsel %vm453_vm3, 1.0, %v1082_v44  ;;  %v630_v61 = vadd.f32 1.0, %v622_v57  ;;  %v730_v62 = vpop.permute.xlu1 %729 }
 0x119   : > { %v617_v49 = vsub.f32 1.0, %v609_v39  ;;  %v624_v43 = vmul.f32 %v616_v38, %v464_v54  ;;  %v621_v2 = vmul.f32 %v613_v52, %v461_v21  ;;  %v628_v14 = vadd.f32 1.0, %v620_v63 }
 0x11a   : > { %v610_v55 = vmul.f32 %v1002_v9, %v570_v50  ;;  %v631_v13 = vadd.f32 1.0, %v623_v60  ;;  %v442_v15 = vmul.f32 0.5, %v1241_v56  ;;  %v439_v26 = vmul.f32 0.5, %v1224_v42 }
 0x11b   : > { %v625_v35 = vmul.f32 %v617_v49, %v465_v53  ;;  %v632_v4 = vadd.f32 1.0, %v624_v43  ;;  %v629_v18 = vadd.f32 1.0, %v621_v2  ;;  %v436_v22 = vmul.f32 0.5, %v1205_v20 }
 0x11c   : > { %v618_v1 = vsub.f32 1.0, %v610_v55  ;;  %v638_v23 = vmul.f32 %v630_v61, %v438_v24  ;;  %v627_v28 = vadd.f32 1.0, %v619_v10  ;;  %v639_v51 = vmul.f32 %v631_v13, %v439_v26 }
 0x11d   : > { %v633_v6 = vadd.f32 1.0, %v625_v35  ;;  %v640_v27 = vmul.f32 %v632_v4, %v440_v29  ;;  %v636_v31 = vmul.f32 %v628_v14, %v436_v22  ;;  %v637_v56 = vmul.f32 %v629_v18, %v437_v30 }
 0x11e   : > { %v626_v8 = vmul.f32 %v618_v1, %v466_v3  ;;  %v635_v42 = vmul.f32 %v627_v28, %v435_v45 }
 0x11f   : > { %v641_v19 = vmul.f32 %v633_v6, %v441_v12  ;;  %v650_v32 = vpack.c.bf16 %v638_v23, %v636_v31 }
 0x120   : > { %v634_v16 = vadd.f32 1.0, %v626_v8  ;;  %v649_v20 = vpack.c.bf16 %v637_v56, %v635_v42 }
 0x121   : > { %v651_v11 = vpack.c.bf16 %v641_v19, %v639_v51 }
 0x122   : > { %v642_v5 = vmul.f32 %v634_v16, %v442_v15 }
 0x124   : > { %v652_v48 = vpack.c.bf16 %v642_v5, %v640_v27 }
 0x126   : > { %674 = vmatprep.subr.bf16.mxu1 %v652_v48 }
 0x127   : > { %675 = vmatpush1.bf16.msra.mxu1 %v651_v11 }
 0x128   : > { %676 = vmatprep.subr.bf16.mxu1 %v650_v32 }
 0x12b   : > { %677 = vmatpush1.bf16.msra.mxu1 %v649_v20 }
 0x12e   : > { %899 = vmatmul.mubr.msk.bf16.vlgmr.msra.gmra.mxu1 %vm658_vm9, %v970_v33 }
 0x1ee   : > { %v696_v17 = vpop.f32.mrf.mxu1 }
 0x1ef   : > { %v732_v34 = vadd.f32 %v725_v25, %v696_v17 }
 0x1f0   : > { %v698_v36 = vpop.f32.mrf.mxu1 }
 0x1f1   : > { %736 = vst [vmem:[%s294_s17] sm:$0xff] %v732_v34  ;;  %v733_v37 = vadd.f32 %v725_v25, %v698_v36 }
 0x1f2   : > { %v700_v0 = vpop.f32.mrf.mxu1 }
 0x1f3   : > { %737 = vst [vmem:[%s294_s17 + $0x8] sm:$0xff] %v733_v37  ;;  %v734_v38 = vadd.f32 %v730_v62, %v700_v0 }
 0x1f4   : > { %v702_v39 = vpop.f32.mrf.mxu1 }
 0x1f5   : > { %738 = vst [vmem:[%s294_s17 + $0x10] sm:$0xff] %v734_v38  ;;  %v735_v40 = vadd.f32 %v730_v62, %v702_v39 }
 0x1f7   : > { %739 = vst [vmem:[%s294_s17 + $0x18] sm:$0xff] %v735_v40 }
 0x1f8   : > { %1016 = shalt.err (!%p1013_p5)
}
 0x1f9   : > { %s1017_s12 = scalar_lea.hbm %s1338_s7, 512  ;;  %s1021_s15 = scalar_lea.hbm %s1390_s5, 1024 }
 0x1fa   : > { %p1018_p6 = scmp.ne.s32.totalorder %s1338_s7, %s1017_s12  ;;  %p1022_p10 = scmp.lt.s32.totalorder %s1338_s7, %s1390_s5 }
 0x1fb   : > { %p1023_p11 = scmp.lt.s32.totalorder %s1021_s15, %s1017_s12 }
 0x1fc   : > { %p1019_p7 = pnand %p1018_p6, %p1156_p4 }
 0x1fd   : > { %p1024_p12 = por %p1023_p11, %p1022_p10 }
 0x1fe   : > { %p1020_p9 = pneg %p1019_p7 }
 0x200   : > { %p1025_p13 = pnand %p1024_p12, %p1020_p9 }
 0x202   : > { %1028 = shalt.err (!%p1025_p13)
}
 0x203   : > { %s1084_s25 = smov 256   ;;  %s1085_s27 = smov 16  }
 0x204   : > { %907 = dma.vmem_to_hbm [thread:$0]  (%p1156_p4), %s1333_s24, 512, %s1338_s7, %s1340_s8, %s1084_s25, %s1084_s25, %s1085_s27  }
 0x205 PF: > { %p913_p0 = scmp.ge.s32.totalorder %s1079_s23, 2  ;;  %s771_s29 = sand.u32 1, %s1059_s18  }
 0x206   : > { %s772_s9 = scalar_lea.sflag [#allocation4], %s771_s29 }
 0x207   : > { %p910_p1 = pnand %p913_p0, %p1163_p8 }
 0x209   : > { %p911_p2 = pneg %p910_p1 }
 0x20b   : > { %1054 = dma.done.wait (%p911_p2), %s772_s9, 512  }
 0x20c   : > { %1056 = vsyncadd (%p911_p2), %s772_s9, 4294966784  ;;  %s18_s23 = sadd.s32 1, %s1079_s23   ;;  %s1393_s18 = smov %s1063_s19 }
 0x20d   : > { %p15_p3 = scmp.ge.s32.totalorder %s18_s23, 4   ;;  %s1394_s19 = smov %s1067_s20 }
 0x20e   : > { %s1395_s20 = smov %s1169_s6  ;;  %s1396_s21 = smov %s1075_s22 }
 0x20f   : > { %s1397_s22 = smov %s1399_s26  ;;  %17 = sbr.rel (!%p15_p3) target bundleno = 4 (0x4), region = 92 }
 0x214   :  { %777 = vsyncpa [#allocation4], 1 }
 0x215   :  { %779 = vsyncpa [#allocation4 + $0x1], 1 }

</bundles_post_ra>
